<compile_context>
chip_gen: v6e
topology: v6e:2x2x1
jax: 0.10.0
libtpu: 0.0.40
codegen_flags: <defaults>
</compile_context>

<pallas_src>
import functools

import jax
import jax.numpy as jnp
from jax.experimental import pallas as pl
from jax.experimental.pallas import tpu as pltpu


def _round_up(x, m):
    return (x + m - 1) // m * m


def gru_classifier_kernel(x_ref, wi_ref, wh_ref, b_ref, bhn_ref,
                          wl_ref, bl_ref, o_ref, h_ref):
    """One (batch-tile, time-tile) grid step of the GRU classifier.

    x_ref  : (Tt, Bt, E)   time-tile of the embedded input (time-major)
    wi_ref : (E, 3H)       fused input->hidden weights  [r | z | n]
    wh_ref : (H, 3H)       fused hidden->hidden weights [r | z | n]
    b_ref  : (1, 3H)       [b_ir+b_hr | b_iz+b_hz | b_in]
    bhn_ref: (1, H)        b_hn (kept separate: it is multiplied by r)
    wl_ref : (H, C)        final linear weight (transposed)
    bl_ref : (1, C)        final linear bias
    o_ref  : (Bt, C)       output logits (written on the last time tile)
    h_ref  : (Bt, H) f32   hidden-state scratch, persists across the time axis
    """
    t_idx = pl.program_id(1)
    Tt, Bt, E = x_ref.shape
    H = wh_ref.shape[0]

    @pl.when(t_idx == 0)
    def _():
        h_ref[...] = jnp.zeros_like(h_ref)

    # Hoisted input projection: ONE (Tt*Bt, E) x (E, 3H) MXU matmul per tile.
    x_flat = x_ref[...].reshape(Tt * Bt, E)
    xp = (jnp.dot(x_flat, wi_ref[...], preferred_element_type=jnp.float32)
          + b_ref[...]).reshape(Tt, Bt, 3 * H)

    wh = wh_ref[...]
    bhn = jnp.broadcast_to(bhn_ref[...], (Bt, H))  # hoisted out of the loop

    # Serial recurrence: one (Bt,H)x(H,3H) matmul per step, fully unrolled.
    h = h_ref[...]
    for i in range(Tt):
        hp = jnp.dot(h.astype(wh.dtype), wh,
                     preferred_element_type=jnp.float32)
        r = jax.nn.sigmoid(xp[i, :, 0:H] + hp[:, 0:H])
        z = jax.nn.sigmoid(xp[i, :, H:2 * H] + hp[:, H:2 * H])
        n = jnp.tanh(xp[i, :, 2 * H:3 * H] + r * (hp[:, 2 * H:3 * H] + bhn))
        h = (1.0 - z) * n + z * h
    h_ref[...] = h

    @pl.when(t_idx == pl.num_programs(1) - 1)
    def _():
        o_ref[...] = (jnp.dot(h.astype(wl_ref.dtype), wl_ref[...],
                              preferred_element_type=jnp.float32)
                      + bl_ref[...]).astype(o_ref.dtype)


@functools.partial(jax.jit,
                   static_argnames=("compute_dtype", "time_tile", "batch_tile"))
def classifier_forward(sentences, params, *, compute_dtype=jnp.float32,
                       time_tile=4, batch_tile=128):
    """sentences: (B, T) int32 token ids -> (B, n_classes) float32 logits."""
    emb = params["embedding"]              # (V, E) f32
    wi, wh = params["wi"], params["wh"]    # (3, E, H), (3, H, H)  (pre-transposed)
    bi, bh = params["bi"], params["bh"]    # (3, H), (3, H)
    wl, bl = params["wl"], params["bl"]    # (H, C), (C,)

    B, T = sentences.shape
    E = emb.shape[1]
    H = wh.shape[-1]
    C = wl.shape[-1]

    # --- pad to lane/sublane-friendly shapes; zero padding keeps the GRU
    #     semantics exact (padded hidden lanes stay identically zero). ---
    B_pad = _round_up(B, 8)
    E_pad = _round_up(E, 128)
    H_pad = _round_up(H, 128)
    C_pad = _round_up(C, 128)
    G = 3 * H_pad

    def pad2(a, r, c):
        return jnp.pad(a, ((0, r - a.shape[0]), (0, c - a.shape[1])))

    def pad1(v, n):
        return jnp.pad(v, (0, n - v.shape[0]))

    # Fused (+padded) weights, gate order [r | z | n].
    wi_f = jnp.concatenate([pad2(wi[g], E_pad, H_pad) for g in range(3)], axis=1)
    wh_f = jnp.concatenate([pad2(wh[g], H_pad, H_pad) for g in range(3)], axis=1)
    # Combined biases folded into the input projection; b_hn kept separate.
    b_f = jnp.concatenate([pad1(bi[0] + bh[0], H_pad),
                           pad1(bi[1] + bh[1], H_pad),
                           pad1(bi[2], H_pad)]).reshape(1, G)
    bhn = pad1(bh[2], H_pad).reshape(1, H_pad)
    wl_p = pad2(wl, H_pad, C_pad)
    bl_p = pad1(bl, C_pad).reshape(1, C_pad)

    # Embedding lookup (gather) stays in plain JAX; time-major + padded layout.
    x = jnp.transpose(emb[sentences], (1, 0, 2))            # (T, B, E)
    x = jnp.pad(x, ((0, 0), (0, B_pad - B), (0, E_pad - E)))

    # bf16 only for the MXU operands; biases/accumulation/gates stay f32.
    x = x.astype(compute_dtype)
    wi_f = wi_f.astype(compute_dtype)
    wh_f = wh_f.astype(compute_dtype)
    wl_p = wl_p.astype(compute_dtype)

    # Tile sizes: Tt divides T (small -> VMEM-safe, incl. v7x's 64 MiB budget),
    # Bt divides B_pad and is a multiple of 8.
    Tt = max(d for d in range(1, min(time_tile, T) + 1) if T % d == 0)
    batch_tile = max(batch_tile, 8)
    Bt = max(d for d in range(8, min(batch_tile, B_pad) + 1, 8)
             if B_pad % d == 0)
    grid = (B_pad // Bt, T // Tt)

    const = lambda b, t: (0, 0)
    out = pl.pallas_call(
        gru_classifier_kernel,
        out_shape=jax.ShapeDtypeStruct((B_pad, C_pad), jnp.float32),
        grid_spec=pltpu.PrefetchScalarGridSpec(
            num_scalar_prefetch=0,
            grid=grid,
            in_specs=[
                pl.BlockSpec((Tt, Bt, E_pad), lambda b, t: (t, b, 0)),  # x
                pl.BlockSpec((E_pad, G), const),       # Wi fused
                pl.BlockSpec((H_pad, G), const),       # Wh fused
                pl.BlockSpec((1, G), const),           # combined bias
                pl.BlockSpec((1, H_pad), const),       # b_hn
                pl.BlockSpec((H_pad, C_pad), const),   # linear W
                pl.BlockSpec((1, C_pad), const),       # linear b
            ],
            out_specs=pl.BlockSpec((Bt, C_pad), lambda b, t: (b, 0)),
            scratch_shapes=[pltpu.VMEM((Bt, H_pad), jnp.float32)],
        ),
        compiler_params=pltpu.CompilerParams(
            dimension_semantics=("parallel", "arbitrary")),
    )(x, wi_f, wh_f, b_f, bhn, wl_p, bl_p)

    return out[:B, :C]


def init_params(key, vocab_size, embedding_dim, hidden_size, n_classes):
    """Deterministic parameter init (PyTorch-style uniform ranges)."""
    ks = jax.random.split(key, 8)
    E, H, C = embedding_dim, hidden_size, n_classes
    bound = 1.0 / jnp.sqrt(jnp.float32(H))
    u = lambda k, shape: jax.random.uniform(k, shape, jnp.float32, -bound, bound)
    return {
        # frozen embedding table (stand-in for weights_train_matrix)
        "embedding": jax.random.normal(ks[0], (vocab_size, E), jnp.float32),
        # GRU weights, gate order [r, z, n], stored transposed for x @ W
        "wi": u(ks[1], (3, E, H)),
        "wh": u(ks[2], (3, H, H)),
        "bi": u(ks[3], (3, H)),
        "bh": u(ks[4], (3, H)),
        # final Linear(hidden_size, n_classes), stored transposed for h @ W
        "wl": u(ks[5], (H, C)),
        "bl": u(ks[6], (C,)),
    }


def reference_forward(sentences, params):
    """Pure-JAX reference replicating the PyTorch semantics (for validation)."""
    x = params["embedding"][sentences]  # (B, T, E)
    B, T, _ = x.shape
    H = params["wh"].shape[-1]
    wir, wiz, win = params["wi"]
    whr, whz, whn = params["wh"]
    bir, biz, bin_ = params["bi"]
    bhr, bhz, bhn = params["bh"]
    h = jnp.zeros((B, H), jnp.float32)
    for t in range(T):
        xt = x[:, t, :]
        r = jax.nn.sigmoid(xt @ wir + bir + h @ whr + bhr)
        z = jax.nn.sigmoid(xt @ wiz + biz + h @ whz + bhz)
        n = jnp.tanh(xt @ win + bin_ + r * (h @ whn + bhn))
        h = (1.0 - z) * n + z * h
    return h @ params["wl"] + params["bl"]


if __name__ == "__main__":
    key = jax.random.PRNGKey(0)
    k_param, k_tok = jax.random.split(key)

    vocab_size = 50
    embedding_dim = 32
    hidden_size = 32
    n_classes = 3
    batch = 2
    seq_len = 8

    params = init_params(k_param, vocab_size, embedding_dim, hidden_size,
                         n_classes)
    sentences = jax.random.randint(k_tok, (batch, seq_len), 0, vocab_size,
                                   dtype=jnp.int32)

    ref = reference_forward(sentences, params)

    # f32 path: exact match against the reference.
    out = jax.block_until_ready(classifier_forward(sentences, params))
    assert out.shape == (batch, n_classes)
    assert jnp.allclose(out, ref, atol=1e-5, rtol=1e-5), "f32 mismatch vs ref"

    # bf16 MXU-operand path (f32 accumulation / gates / hidden carry).
    out_bf16 = jax.block_until_ready(
        classifier_forward(sentences, params, compute_dtype=jnp.bfloat16))
    assert jnp.allclose(out_bf16, ref, atol=5e-2, rtol=5e-2), \
        "bf16 mismatch vs ref"

    print("KERNEL_OK")
</pallas_src>

<mosaic_0001>
module attributes {stable_mosaic.version = 11 : i64} {
  func.func @gru_classifier_kernel(%arg0: i32, %arg1: i32, %arg2: memref<4x8x128xf32, #tpu.memory_space<vmem>>, %arg3: memref<128x384xf32, #tpu.memory_space<vmem>>, %arg4: memref<128x384xf32, #tpu.memory_space<vmem>>, %arg5: memref<1x384xf32, #tpu.memory_space<vmem>>, %arg6: memref<1x128xf32, #tpu.memory_space<vmem>>, %arg7: memref<128x128xf32, #tpu.memory_space<vmem>>, %arg8: memref<1x128xf32, #tpu.memory_space<vmem>>, %arg9: memref<8x128xf32, #tpu.memory_space<vmem>>, %arg10: memref<8x128xf32, #tpu.memory_space<vmem>>) attributes {dimension_semantics = [#tpu.dimension_semantics<parallel>, #tpu.dimension_semantics<arbitrary>], iteration_bounds = array<i64: 1, 2>, scalar_prefetch = 0 : i64, scratch_operands = 1 : i64, tpu.core_type = #tpu.core_type<tc>, window_params = [{transform_indices = @transform_0, window_bounds = array<i64: 4, 8, 128>}, {pipeline_mode = #tpu.pipeline_mode<synchronous>, transform_indices = @transform_1, window_bounds = array<i64: 128, 384>}, {pipeline_mode = #tpu.pipeline_mode<synchronous>, transform_indices = @transform_2, window_bounds = array<i64: 128, 384>}, {pipeline_mode = #tpu.pipeline_mode<synchronous>, transform_indices = @transform_3, window_bounds = array<i64: 1, 384>}, {pipeline_mode = #tpu.pipeline_mode<synchronous>, transform_indices = @transform_4, window_bounds = array<i64: 1, 128>}, {pipeline_mode = #tpu.pipeline_mode<synchronous>, transform_indices = @transform_5, window_bounds = array<i64: 128, 128>}, {pipeline_mode = #tpu.pipeline_mode<synchronous>, transform_indices = @transform_6, window_bounds = array<i64: 1, 128>}, {transform_indices = @transform_7, window_bounds = array<i64: 8, 128>}]} {
    %c0_i32 = arith.constant 0 : i32
    %0 = arith.cmpi eq, %arg1, %c0_i32 : i32
    %1 = arith.extui %0 : i1 to i32
    %c0_i32_0 = arith.constant 0 : i32
    %2 = arith.cmpi ne, %1, %c0_i32_0 : i32
    scf.if %2 {
      %cst_32 = arith.constant 0.000000e+00 : f32
      %144 = vector.broadcast %cst_32 : f32 to vector<8x128xf32>
      %c0_33 = arith.constant 0 : index
      %c0_34 = arith.constant 0 : index
      %145 = vector.load %arg10[%c0_33, %c0_34] : memref<8x128xf32, #tpu.memory_space<vmem>>, vector<8x128xf32>
      tpu.vector_store %arg10[%c0_33, %c0_34], %144 {strides = array<i32>} : memref<8x128xf32, #tpu.memory_space<vmem>>, vector<8x128xf32>,
    } else {
    }
    %c0 = arith.constant 0 : index
    %c0_1 = arith.constant 0 : index
    %c0_2 = arith.constant 0 : index
    %3 = vector.load %arg2[%c0, %c0_1, %c0_2] : memref<4x8x128xf32, #tpu.memory_space<vmem>>, vector<4x8x128xf32>
    %4 = vector.shape_cast %3 : vector<4x8x128xf32> to vector<32x128xf32>
    %c0_3 = arith.constant 0 : index
    %c0_4 = arith.constant 0 : index
    %5 = vector.load %arg3[%c0_3, %c0_4] : memref<128x384xf32, #tpu.memory_space<vmem>>, vector<128x384xf32>
    %cst = arith.constant dense<0.000000e+00> : vector<32x384xf32>
    %6 = tpu.matmul %4, %5, %cst {dimension_numbers = #tpu.dot_dimension_numbers<[1], [0], [0], [1], [0, 0, 1, 1], [], []>} : vector<32x128xf32>, vector<128x384xf32>, vector<32x384xf32> -> vector<32x384xf32>
    %c0_5 = arith.constant 0 : index
    %c0_6 = arith.constant 0 : index
    %7 = vector.load %arg5[%c0_5, %c0_6] : memref<1x384xf32, #tpu.memory_space<vmem>>, vector<1x384xf32>
    %8 = vector.broadcast %7 : vector<1x384xf32> to vector<32x384xf32>
    %9 = arith.addf %6, %8 : vector<32x384xf32>
    %10 = vector.shape_cast %9 : vector<32x384xf32> to vector<4x8x384xf32>
    %c0_7 = arith.constant 0 : index
    %c0_8 = arith.constant 0 : index
    %11 = vector.load %arg4[%c0_7, %c0_8] : memref<128x384xf32, #tpu.memory_space<vmem>>, vector<128x384xf32>
    %c0_9 = arith.constant 0 : index
    %c0_10 = arith.constant 0 : index
    %12 = vector.load %arg6[%c0_9, %c0_10] : memref<1x128xf32, #tpu.memory_space<vmem>>, vector<1x128xf32>
    %13 = vector.shape_cast %12 : vector<1x128xf32> to vector<1x128xf32>
    %14 = vector.broadcast %13 : vector<1x128xf32> to vector<8x128xf32>
    %c0_11 = arith.constant 0 : index
    %c0_12 = arith.constant 0 : index
    %15 = vector.load %arg10[%c0_11, %c0_12] : memref<8x128xf32, #tpu.memory_space<vmem>>, vector<8x128xf32>
    %cst_13 = arith.constant dense<0.000000e+00> : vector<8x384xf32>
    %16 = tpu.matmul %15, %11, %cst_13 {dimension_numbers = #tpu.dot_dimension_numbers<[1], [0], [0], [1], [0, 0, 1, 1], [], []>} : vector<8x128xf32>, vector<128x384xf32>, vector<8x384xf32> -> vector<8x384xf32>
    %17 = vector.extract_strided_slice %10 {offsets = [0, 0, 0], sizes = [1, 8, 128], strides = [1, 1, 1]} : vector<4x8x384xf32> to vector<1x8x128xf32>
    %18 = vector.shape_cast %17 : vector<1x8x128xf32> to vector<8x128xf32>
    %19 = vector.extract_strided_slice %16 {offsets = [0, 0], sizes = [8, 128], strides = [1, 1]} : vector<8x384xf32> to vector<8x128xf32>
    %20 = arith.addf %18, %19 : vector<8x128xf32>
    %21 = arith.negf %20 : vector<8x128xf32>
    %22 = math.exp %21 : vector<8x128xf32>
    %cst_14 = arith.constant 1.000000e+00 : f32
    %23 = vector.broadcast %cst_14 : f32 to vector<8x128xf32>
    %24 = arith.addf %23, %22 : vector<8x128xf32>
    %25 = arith.divf %23, %24 : vector<8x128xf32>
    %26 = vector.extract_strided_slice %10 {offsets = [0, 0, 128], sizes = [1, 8, 128], strides = [1, 1, 1]} : vector<4x8x384xf32> to vector<1x8x128xf32>
    %27 = vector.shape_cast %26 : vector<1x8x128xf32> to vector<8x128xf32>
    %28 = vector.extract_strided_slice %16 {offsets = [0, 128], sizes = [8, 128], strides = [1, 1]} : vector<8x384xf32> to vector<8x128xf32>
    %29 = arith.addf %27, %28 : vector<8x128xf32>
    %30 = arith.negf %29 : vector<8x128xf32>
    %31 = math.exp %30 : vector<8x128xf32>
    %cst_15 = arith.constant 1.000000e+00 : f32
    %32 = vector.broadcast %cst_15 : f32 to vector<8x128xf32>
    %33 = arith.addf %32, %31 : vector<8x128xf32>
    %34 = arith.divf %32, %33 : vector<8x128xf32>
    %35 = vector.extract_strided_slice %10 {offsets = [0, 0, 256], sizes = [1, 8, 128], strides = [1, 1, 1]} : vector<4x8x384xf32> to vector<1x8x128xf32>
    %36 = vector.shape_cast %35 : vector<1x8x128xf32> to vector<8x128xf32>
    %37 = vector.extract_strided_slice %16 {offsets = [0, 256], sizes = [8, 128], strides = [1, 1]} : vector<8x384xf32> to vector<8x128xf32>
    %38 = arith.addf %37, %14 : vector<8x128xf32>
    %39 = arith.mulf %25, %38 : vector<8x128xf32>
    %40 = arith.addf %36, %39 : vector<8x128xf32>
    %41 = math.tanh %40 : vector<8x128xf32>
    %cst_16 = arith.constant 1.000000e+00 : f32
    %42 = vector.broadcast %cst_16 : f32 to vector<8x128xf32>
    %43 = arith.subf %42, %34 : vector<8x128xf32>
    %44 = arith.mulf %43, %41 : vector<8x128xf32>
    %45 = arith.mulf %34, %15 : vector<8x128xf32>
    %46 = arith.addf %44, %45 : vector<8x128xf32>
    %cst_17 = arith.constant dense<0.000000e+00> : vector<8x384xf32>
    %47 = tpu.matmul %46, %11, %cst_17 {dimension_numbers = #tpu.dot_dimension_numbers<[1], [0], [0], [1], [0, 0, 1, 1], [], []>} : vector<8x128xf32>, vector<128x384xf32>, vector<8x384xf32> -> vector<8x384xf32>
    %48 = vector.extract_strided_slice %10 {offsets = [1, 0, 0], sizes = [1, 8, 128], strides = [1, 1, 1]} : vector<4x8x384xf32> to vector<1x8x128xf32>
    %49 = vector.shape_cast %48 : vector<1x8x128xf32> to vector<8x128xf32>
    %50 = vector.extract_strided_slice %47 {offsets = [0, 0], sizes = [8, 128], strides = [1, 1]} : vector<8x384xf32> to vector<8x128xf32>
    %51 = arith.addf %49, %50 : vector<8x128xf32>
    %52 = arith.negf %51 : vector<8x128xf32>
    %53 = math.exp %52 : vector<8x128xf32>
    %cst_18 = arith.constant 1.000000e+00 : f32
    %54 = vector.broadcast %cst_18 : f32 to vector<8x128xf32>
    %55 = arith.addf %54, %53 : vector<8x128xf32>
    %56 = arith.divf %54, %55 : vector<8x128xf32>
    %57 = vector.extract_strided_slice %10 {offsets = [1, 0, 128], sizes = [1, 8, 128], strides = [1, 1, 1]} : vector<4x8x384xf32> to vector<1x8x128xf32>
    %58 = vector.shape_cast %57 : vector<1x8x128xf32> to vector<8x128xf32>
    %59 = vector.extract_strided_slice %47 {offsets = [0, 128], sizes = [8, 128], strides = [1, 1]} : vector<8x384xf32> to vector<8x128xf32>
    %60 = arith.addf %58, %59 : vector<8x128xf32>
    %61 = arith.negf %60 : vector<8x128xf32>
    %62 = math.exp %61 : vector<8x128xf32>
    %cst_19 = arith.constant 1.000000e+00 : f32
    %63 = vector.broadcast %cst_19 : f32 to vector<8x128xf32>
    %64 = arith.addf %63, %62 : vector<8x128xf32>
    %65 = arith.divf %63, %64 : vector<8x128xf32>
    %66 = vector.extract_strided_slice %10 {offsets = [1, 0, 256], sizes = [1, 8, 128], strides = [1, 1, 1]} : vector<4x8x384xf32> to vector<1x8x128xf32>
    %67 = vector.shape_cast %66 : vector<1x8x128xf32> to vector<8x128xf32>
    %68 = vector.extract_strided_slice %47 {offsets = [0, 256], sizes = [8, 128], strides = [1, 1]} : vector<8x384xf32> to vector<8x128xf32>
    %69 = arith.addf %68, %14 : vector<8x128xf32>
    %70 = arith.mulf %56, %69 : vector<8x128xf32>
    %71 = arith.addf %67, %70 : vector<8x128xf32>
    %72 = math.tanh %71 : vector<8x128xf32>
    %cst_20 = arith.constant 1.000000e+00 : f32
    %73 = vector.broadcast %cst_20 : f32 to vector<8x128xf32>
    %74 = arith.subf %73, %65 : vector<8x128xf32>
    %75 = arith.mulf %74, %72 : vector<8x128xf32>
    %76 = arith.mulf %65, %46 : vector<8x128xf32>
    %77 = arith.addf %75, %76 : vector<8x128xf32>
    %cst_21 = arith.constant dense<0.000000e+00> : vector<8x384xf32>
    %78 = tpu.matmul %77, %11, %cst_21 {dimension_numbers = #tpu.dot_dimension_numbers<[1], [0], [0], [1], [0, 0, 1, 1], [], []>} : vector<8x128xf32>, vector<128x384xf32>, vector<8x384xf32> -> vector<8x384xf32>
    %79 = vector.extract_strided_slice %10 {offsets = [2, 0, 0], sizes = [1, 8, 128], strides = [1, 1, 1]} : vector<4x8x384xf32> to vector<1x8x128xf32>
    %80 = vector.shape_cast %79 : vector<1x8x128xf32> to vector<8x128xf32>
    %81 = vector.extract_strided_slice %78 {offsets = [0, 0], sizes = [8, 128], strides = [1, 1]} : vector<8x384xf32> to vector<8x128xf32>
    %82 = arith.addf %80, %81 : vector<8x128xf32>
    %83 = arith.negf %82 : vector<8x128xf32>
    %84 = math.exp %83 : vector<8x128xf32>
    %cst_22 = arith.constant 1.000000e+00 : f32
    %85 = vector.broadcast %cst_22 : f32 to vector<8x128xf32>
    %86 = arith.addf %85, %84 : vector<8x128xf32>
    %87 = arith.divf %85, %86 : vector<8x128xf32>
    %88 = vector.extract_strided_slice %10 {offsets = [2, 0, 128], sizes = [1, 8, 128], strides = [1, 1, 1]} : vector<4x8x384xf32> to vector<1x8x128xf32>
    %89 = vector.shape_cast %88 : vector<1x8x128xf32> to vector<8x128xf32>
    %90 = vector.extract_strided_slice %78 {offsets = [0, 128], sizes = [8, 128], strides = [1, 1]} : vector<8x384xf32> to vector<8x128xf32>
    %91 = arith.addf %89, %90 : vector<8x128xf32>
    %92 = arith.negf %91 : vector<8x128xf32>
    %93 = math.exp %92 : vector<8x128xf32>
    %cst_23 = arith.constant 1.000000e+00 : f32
    %94 = vector.broadcast %cst_23 : f32 to vector<8x128xf32>
    %95 = arith.addf %94, %93 : vector<8x128xf32>
    %96 = arith.divf %94, %95 : vector<8x128xf32>
    %97 = vector.extract_strided_slice %10 {offsets = [2, 0, 256], sizes = [1, 8, 128], strides = [1, 1, 1]} : vector<4x8x384xf32> to vector<1x8x128xf32>
    %98 = vector.shape_cast %97 : vector<1x8x128xf32> to vector<8x128xf32>
    %99 = vector.extract_strided_slice %78 {offsets = [0, 256], sizes = [8, 128], strides = [1, 1]} : vector<8x384xf32> to vector<8x128xf32>
    %100 = arith.addf %99, %14 : vector<8x128xf32>
    %101 = arith.mulf %87, %100 : vector<8x128xf32>
    %102 = arith.addf %98, %101 : vector<8x128xf32>
    %103 = math.tanh %102 : vector<8x128xf32>
    %cst_24 = arith.constant 1.000000e+00 : f32
    %104 = vector.broadcast %cst_24 : f32 to vector<8x128xf32>
    %105 = arith.subf %104, %96 : vector<8x128xf32>
    %106 = arith.mulf %105, %103 : vector<8x128xf32>
    %107 = arith.mulf %96, %77 : vector<8x128xf32>
    %108 = arith.addf %106, %107 : vector<8x128xf32>
    %cst_25 = arith.constant dense<0.000000e+00> : vector<8x384xf32>
    %109 = tpu.matmul %108, %11, %cst_25 {dimension_numbers = #tpu.dot_dimension_numbers<[1], [0], [0], [1], [0, 0, 1, 1], [], []>} : vector<8x128xf32>, vector<128x384xf32>, vector<8x384xf32> -> vector<8x384xf32>
    %110 = vector.extract_strided_slice %10 {offsets = [3, 0, 0], sizes = [1, 8, 128], strides = [1, 1, 1]} : vector<4x8x384xf32> to vector<1x8x128xf32>
    %111 = vector.shape_cast %110 : vector<1x8x128xf32> to vector<8x128xf32>
    %112 = vector.extract_strided_slice %109 {offsets = [0, 0], sizes = [8, 128], strides = [1, 1]} : vector<8x384xf32> to vector<8x128xf32>
    %113 = arith.addf %111, %112 : vector<8x128xf32>
    %114 = arith.negf %113 : vector<8x128xf32>
    %115 = math.exp %114 : vector<8x128xf32>
    %cst_26 = arith.constant 1.000000e+00 : f32
    %116 = vector.broadcast %cst_26 : f32 to vector<8x128xf32>
    %117 = arith.addf %116, %115 : vector<8x128xf32>
    %118 = arith.divf %116, %117 : vector<8x128xf32>
    %119 = vector.extract_strided_slice %10 {offsets = [3, 0, 128], sizes = [1, 8, 128], strides = [1, 1, 1]} : vector<4x8x384xf32> to vector<1x8x128xf32>
    %120 = vector.shape_cast %119 : vector<1x8x128xf32> to vector<8x128xf32>
    %121 = vector.extract_strided_slice %109 {offsets = [0, 128], sizes = [8, 128], strides = [1, 1]} : vector<8x384xf32> to vector<8x128xf32>
    %122 = arith.addf %120, %121 : vector<8x128xf32>
    %123 = arith.negf %122 : vector<8x128xf32>
    %124 = math.exp %123 : vector<8x128xf32>
    %cst_27 = arith.constant 1.000000e+00 : f32
    %125 = vector.broadcast %cst_27 : f32 to vector<8x128xf32>
    %126 = arith.addf %125, %124 : vector<8x128xf32>
    %127 = arith.divf %125, %126 : vector<8x128xf32>
    %128 = vector.extract_strided_slice %10 {offsets = [3, 0, 256], sizes = [1, 8, 128], strides = [1, 1, 1]} : vector<4x8x384xf32> to vector<1x8x128xf32>
    %129 = vector.shape_cast %128 : vector<1x8x128xf32> to vector<8x128xf32>
    %130 = vector.extract_strided_slice %109 {offsets = [0, 256], sizes = [8, 128], strides = [1, 1]} : vector<8x384xf32> to vector<8x128xf32>
    %131 = arith.addf %130, %14 : vector<8x128xf32>
    %132 = arith.mulf %118, %131 : vector<8x128xf32>
    %133 = arith.addf %129, %132 : vector<8x128xf32>
    %134 = math.tanh %133 : vector<8x128xf32>
    %cst_28 = arith.constant 1.000000e+00 : f32
    %135 = vector.broadcast %cst_28 : f32 to vector<8x128xf32>
    %136 = arith.subf %135, %127 : vector<8x128xf32>
    %137 = arith.mulf %136, %134 : vector<8x128xf32>
    %138 = arith.mulf %127, %108 : vector<8x128xf32>
    %139 = arith.addf %137, %138 : vector<8x128xf32>
    %c0_29 = arith.constant 0 : index
    %c0_30 = arith.constant 0 : index
    %140 = vector.load %arg10[%c0_29, %c0_30] : memref<8x128xf32, #tpu.memory_space<vmem>>, vector<8x128xf32>
    tpu.vector_store %arg10[%c0_29, %c0_30], %139 {strides = array<i32>} : memref<8x128xf32, #tpu.memory_space<vmem>>, vector<8x128xf32>,
    %c1_i32 = arith.constant 1 : i32
    %141 = arith.cmpi eq, %arg1, %c1_i32 : i32
    %142 = arith.extui %141 : i1 to i32
    %c0_i32_31 = arith.constant 0 : i32
    %143 = arith.cmpi ne, %142, %c0_i32_31 : i32
    scf.if %143 {
      %c0_32 = arith.constant 0 : index
      %c0_33 = arith.constant 0 : index
      %144 = vector.load %arg7[%c0_32, %c0_33] : memref<128x128xf32, #tpu.memory_space<vmem>>, vector<128x128xf32>
      %cst_34 = arith.constant dense<0.000000e+00> : vector<8x128xf32>
      %145 = tpu.matmul %139, %144, %cst_34 {dimension_numbers = #tpu.dot_dimension_numbers<[1], [0], [0], [1], [0, 0, 1, 1], [], []>} : vector<8x128xf32>, vector<128x128xf32>, vector<8x128xf32> -> vector<8x128xf32>
      %c0_35 = arith.constant 0 : index
      %c0_36 = arith.constant 0 : index
      %146 = vector.load %arg8[%c0_35, %c0_36] : memref<1x128xf32, #tpu.memory_space<vmem>>, vector<1x128xf32>
      %147 = vector.broadcast %146 : vector<1x128xf32> to vector<8x128xf32>
      %148 = arith.addf %145, %147 : vector<8x128xf32>
      %c0_37 = arith.constant 0 : index
      %c0_38 = arith.constant 0 : index
      %149 = vector.load %arg9[%c0_37, %c0_38] : memref<8x128xf32, #tpu.memory_space<vmem>>, vector<8x128xf32>
      tpu.vector_store %arg9[%c0_37, %c0_38], %148 {strides = array<i32>} : memref<8x128xf32, #tpu.memory_space<vmem>>, vector<8x128xf32>,
    } else {
    }
    return
  }
  func.func @transform_0(%arg0: i32, %arg1: i32) -> (i32, i32, i32) {
    %c0_i32 = arith.constant 0 : i32
    %c0_i32_0 = arith.constant 0 : i32
    return %arg1, %arg0, %c0_i32 : i32, i32, i32
  }
  func.func @transform_1(%arg0: i32, %arg1: i32) -> (i32, i32) {
    %c0_i32 = arith.constant 0 : i32
    %c0_i32_0 = arith.constant 0 : i32
    %c0_i32_1 = arith.constant 0 : i32
    return %c0_i32, %c0_i32_0 : i32, i32
  }
  func.func @transform_2(%arg0: i32, %arg1: i32) -> (i32, i32) {
    %c0_i32 = arith.constant 0 : i32
    %c0_i32_0 = arith.constant 0 : i32
    %c0_i32_1 = arith.constant 0 : i32
    return %c0_i32, %c0_i32_0 : i32, i32
  }
  func.func @transform_3(%arg0: i32, %arg1: i32) -> (i32, i32) {
    %c0_i32 = arith.constant 0 : i32
    %c0_i32_0 = arith.constant 0 : i32
    %c0_i32_1 = arith.constant 0 : i32
    return %c0_i32, %c0_i32_0 : i32, i32
  }
  func.func @transform_4(%arg0: i32, %arg1: i32) -> (i32, i32) {
    %c0_i32 = arith.constant 0 : i32
    %c0_i32_0 = arith.constant 0 : i32
    %c0_i32_1 = arith.constant 0 : i32
    return %c0_i32, %c0_i32_0 : i32, i32
  }
  func.func @transform_5(%arg0: i32, %arg1: i32) -> (i32, i32) {
    %c0_i32 = arith.constant 0 : i32
    %c0_i32_0 = arith.constant 0 : i32
    %c0_i32_1 = arith.constant 0 : i32
    return %c0_i32, %c0_i32_0 : i32, i32
  }
  func.func @transform_6(%arg0: i32, %arg1: i32) -> (i32, i32) {
    %c0_i32 = arith.constant 0 : i32
    %c0_i32_0 = arith.constant 0 : i32
    %c0_i32_1 = arith.constant 0 : i32
    return %c0_i32, %c0_i32_0 : i32, i32
  }
  func.func @transform_7(%arg0: i32, %arg1: i32) -> (i32, i32) {
    %c0_i32 = arith.constant 0 : i32
    %c0_i32_0 = arith.constant 0 : i32
    return %arg0, %c0_i32 : i32, i32
  }
}

</mosaic_0001>

<bundles_post_ra>
// kernel: classifier_forward.1
= control target key start
LH: loop header
LB: loop body
LE: loop exit
PB: predicated region body
PF: predicated region fallthrough
CT: control target
= control target key end

     0   :  { %s1896_s24 = smov 0   ;;  %s1898_s25 = smov 0   ;;  %s2713_s0 = inlined_call_operand.vmem [shape: f32[8,8,128], index: 0, kind: input, shape index: {}]   ;;  %s2714_s1 = inlined_call_operand.vmem [shape: f32[128,384], index: 1, kind: input, shape index: {}]   ;;  %s2715_s2 = inlined_call_operand.vmem [shape: f32[128,384], index: 2, kind: input, shape index: {}]   ;;  %s2716_s3 = inlined_call_operand.vmem [shape: f32[1,384], index: 3, kind: input, shape index: {}]   ;;  %s2717_s4 = inlined_call_operand.vmem [shape: f32[1,128], index: 4, kind: input, shape index: {}]   ;;  %s2718_s5 = inlined_call_operand.vmem [shape: f32[128,128], index: 5, kind: input, shape index: {}]   ;;  %s2719_s6 = inlined_call_operand.vmem [shape: f32[1,128], index: 6, kind: input, shape index: {}]   ;;  %s2720_s7 = inlined_call_operand.vmem [shape: f32[8,128], index: 7, kind: output, shape index: {}]  }
   0x1   :  { %s1900_s26 = smov 0  }
   0x2 LB: > { %s26_s27 = sadd.s32 1, %s1845_s25  ;;  %p1422_p0 = scmp.ge.s32.totalorder %s1849_s26, 1  ;;  %s1849_s26 = sphi %s1900_s26, %s17_s26   ;;  %s1845_s25 = sphi %s1898_s25, %s2776_s25   ;;  %s1841_s24 = sphi %s1896_s24, %s2775_s24  }
   0x3   : > { %p27_p1 = scmp.ge.s32.totalorder %s26_s27, 2  ;;  %p255_p2 = scmp.lt.s32.totalorder %s1849_s26, 3 }
   0x5   : > { %s2778_s27 = smov (%p27_p1, %s26_s27), 0  ;;  %p256_p3 = pnand %p1422_p0, %p255_p2 }
   0x7   : > { %259 = sbr.rel (%p256_p3) target bundleno = 1312 (0x520), region = 48 }
   0xc   : > { %s1423_s28 = sshll.u32 %s1841_s24, 2  ;;  %p1425_p5 = scmp.ne.s32.totalorder %s1841_s24, 0 }
   0xd   : > { %p290_p4 = scmp.lt.s32.totalorder %s1423_s28, 7 }
   0xe   : > { %305 = sbr.rel (%p1425_p5) target bundleno = 21 (0x15), region = 52 }
   0xf   : > { %s2780_s28 = smov (!%p290_p4, %s1423_s28), 7 }
  0x10   : > { %s1424_s29 = sshll.u32 %s2780_s28, 3 }
  0x11   : > { %s1920_s9 = scalar_lea.vmem %s2713_s0, %s1424_s29 }
  0x13   : > { %v1851_v0 = vmov 0.0  }
  0x14   : > { %306 = vst [vmem:[#allocation2] sm:$0xff] %v1851_v0 }
  0x15 PF: > { %v357_v1 = vld [vmem:[%s2714_s1 + $0x170] sm:$0xff]  ;;  %v356_v2 = vld [vmem:[%s2714_s1 + $0x168] sm:$0xff]  ;;  %v354_v3 = vld [vmem:[%s2714_s1 + $0x158] sm:$0xff]  ;;  %v2721_v5 = vmov 0.0   ;;  %vm1853_vm0 = vmmov 0   ;;  %p1435_p6 = scmp.ne.s32.totalorder %s1841_s24, 1 }
  0x16   : > { %376 = vmatprep.subr.mxu0 %v357_v1  ;;  %v353_v4 = vld [vmem:[%s2714_s1 + $0x150] sm:$0xff]  ;;  %440 = vmatprep.mubr.f32.mxu0 %v2721_v5  ;;  %v351_v6 = vld [vmem:[%s2714_s1 + $0x140] sm:$0xff]  ;;  %v350_v7 = vld [vmem:[%s2714_s1 + $0x138] sm:$0xff] }
  0x17   : > { %377 = vmatpush1.msra.mxu0 %v356_v2  ;;  %v348_v8 = vld [vmem:[%s2714_s1 + $0x128] sm:$0xff]  ;;  %v347_v9 = vld [vmem:[%s2714_s1 + $0x120] sm:$0xff]  ;;  %v345_v10 = vld [vmem:[%s2714_s1 + $0x110] sm:$0xff] }
  0x18   : > { %378 = vmatprep.subr.mxu0 %v354_v3  ;;  %v344_v11 = vld [vmem:[%s2714_s1 + $0x108] sm:$0xff]  ;;  %v342_v12 = vld [vmem:[%s2714_s1 + $0xf8] sm:$0xff]  ;;  %v341_v13 = vld [vmem:[%s2714_s1 + $0xf0] sm:$0xff] }
  0x19   : > { %379 = vmatpush1.msra.mxu0 %v353_v4  ;;  %v339_v14 = vld [vmem:[%s2714_s1 + $0xe0] sm:$0xff]  ;;  %v358_v15 = vld [vmem:[%s2714_s1 + $0x178] sm:$0xff]  ;;  %v336_v18 = vld [vmem:[%s2714_s1 + $0xc8] sm:$0xff] }
  0x1a   : > { %380 = vmatprep.subr.mxu0 %v351_v6  ;;  %v338_v16 = vld [vmem:[%s2714_s1 + $0xd8] sm:$0xff]  ;;  %1545 = vmatprep.subr.mxu1 %v358_v15  ;;  %v355_v17 = vld [vmem:[%s2714_s1 + $0x160] sm:$0xff]  ;;  %v352_v19 = vld [vmem:[%s2714_s1 + $0x148] sm:$0xff] }
  0x1b   : > { %381 = vmatpush1.msra.mxu0 %v350_v7  ;;  %1546 = vmatpush3.msra.mxu1 %v358_v15  ;;  %v335_v20 = vld [vmem:[%s2714_s1 + $0xc0] sm:$0xff]  ;;  %v333_v21 = vld [vmem:[%s2714_s1 + $0xb0] sm:$0xff]  ;;  %v332_v23 = vld [vmem:[%s2714_s1 + $0xa8] sm:$0xff] }
  0x1c   : > { %382 = vmatprep.subr.mxu0 %v348_v8  ;;  %1547 = vmatprep.subr.mxu1 %v355_v17  ;;  %v349_v22 = vld [vmem:[%s2714_s1 + $0x130] sm:$0xff]  ;;  %v330_v24 = vld [vmem:[%s2714_s1 + $0x98] sm:$0xff]  ;;  %v327_v27 = vld [vmem:[%s2714_s1 + $0x80] sm:$0xff] }
  0x1d   : > { %383 = vmatpush1.msra.mxu0 %v347_v9  ;;  %1548 = vmatpush3.msra.mxu1 %v355_v17  ;;  %v346_v25 = vld [vmem:[%s2714_s1 + $0x118] sm:$0xff]  ;;  %v329_v26 = vld [vmem:[%s2714_s1 + $0x90] sm:$0xff]  ;;  %v343_v28 = vld [vmem:[%s2714_s1 + $0x100] sm:$0xff] }
  0x1e   : > { %384 = vmatprep.subr.mxu0 %v345_v10  ;;  %1549 = vmatprep.subr.mxu1 %v352_v19  ;;  %v326_v29 = vld [vmem:[%s2714_s1 + $0x78] sm:$0xff]  ;;  %v324_v30 = vld [vmem:[%s2714_s1 + $0x68] sm:$0xff]  ;;  %v323_v32 = vld [vmem:[%s2714_s1 + $0x60] sm:$0xff] }
  0x1f   : > { %385 = vmatpush1.msra.mxu0 %v344_v11  ;;  %1550 = vmatpush3.msra.mxu1 %v352_v19  ;;  %v340_v31 = vld [vmem:[%s2714_s1 + $0xe8] sm:$0xff]  ;;  %v321_v33 = vld [vmem:[%s2714_s1 + $0x50] sm:$0xff]  ;;  %v318_v36 = vld [vmem:[%s2714_s1 + $0x38] sm:$0xff] }
  0x20   : > { %386 = vmatprep.subr.mxu0 %v342_v12  ;;  %1551 = vmatprep.subr.mxu1 %v349_v22  ;;  %v337_v34 = vld [vmem:[%s2714_s1 + $0xd0] sm:$0xff]  ;;  %v320_v35 = vld [vmem:[%s2714_s1 + $0x48] sm:$0xff]  ;;  %v334_v37 = vld [vmem:[%s2714_s1 + $0xb8] sm:$0xff] }
  0x21   : > { %387 = vmatpush1.msra.mxu0 %v341_v13  ;;  %1552 = vmatpush3.msra.mxu1 %v349_v22  ;;  %v317_v38 = vld [vmem:[%s2714_s1 + $0x30] sm:$0xff]  ;;  %v315_v39 = vld [vmem:[%s2714_s1 + $0x20] sm:$0xff]  ;;  %v314_v41 = vld [vmem:[%s2714_s1 + $0x18] sm:$0xff] }
  0x22   : > { %388 = vmatprep.subr.mxu0 %v339_v14  ;;  %1553 = vmatprep.subr.mxu1 %v346_v25  ;;  %v331_v40 = vld [vmem:[%s2714_s1 + $0xa0] sm:$0xff]  ;;  %v312_v42 = vld [vmem:[%s2714_s1 + $0x8] sm:$0xff]  ;;  %v2059_v46 = vld [vmem:[%s2715_s2 + $0x170] sm:$0xff] }
  0x23   : > { %389 = vmatpush1.msra.mxu0 %v338_v16  ;;  %1554 = vmatpush3.msra.mxu1 %v346_v25  ;;  %v328_v43 = vld [vmem:[%s2714_s1 + $0x88] sm:$0xff]  ;;  %v311_v44 = vld [vmem:[%s2714_s1] sm:$0xff]  ;;  %2738 = vst [vmem:[#allocation3_spill] sm:$0xff] %v2059_v46  ;;  %v2069_v48 = vld [vmem:[%s2715_s2 + $0x158] sm:$0xff] }
  0x24   : > { %390 = vmatprep.subr.mxu0 %v336_v18  ;;  %1555 = vmatprep.subr.mxu1 %v343_v28  ;;  %v2054_v45 = vld [vmem:[%s1920_s9] sm:$0xff]  ;;  %v2064_v47 = vld [vmem:[%s2715_s2 + $0x168] sm:$0xff]  ;;  %v325_v49 = vld [vmem:[%s2714_s1 + $0x70] sm:$0xff] }
  0x25   : > { %391 = vmatpush1.msra.mxu0 %v335_v20  ;;  %1556 = vmatpush3.msra.mxu1 %v343_v28  ;;  %v2079_v50 = vld [vmem:[%s2715_s2 + $0x150] sm:$0xff]  ;;  %v2085_v51 = vld [vmem:[%s2715_s2 + $0x140] sm:$0xff]  ;;  %v308_v52 = vld [vmem:[%s1920_s9 + $0x8] sm:$0xff] }
  0x26   : > { %392 = vmatprep.subr.mxu0 %v333_v21  ;;  %1557 = vmatprep.subr.mxu1 %v340_v31  ;;  %v2093_v53 = vld [vmem:[%s2715_s2 + $0x138] sm:$0xff]  ;;  %v2099_v54 = vld [vmem:[%s2715_s2 + $0x128] sm:$0xff]  ;;  %v2108_v56 = vld [vmem:[%s2715_s2 + $0x120] sm:$0xff] }
  0x27   : > { %393 = vmatpush1.msra.mxu0 %v332_v23  ;;  %1558 = vmatpush3.msra.mxu1 %v340_v31  ;;  %v322_v55 = vld [vmem:[%s2714_s1 + $0x58] sm:$0xff]  ;;  %v2114_v57 = vld [vmem:[%s2715_s2 + $0x110] sm:$0xff]  ;;  %v2124_v59 = vld [vmem:[%s2715_s2 + $0x108] sm:$0xff] }
  0x28   : > { %394 = vmatprep.subr.mxu0 %v330_v24  ;;  %1559 = vmatprep.subr.mxu1 %v337_v34  ;;  %v2118_v58 = vld [vmem:[%s1920_s9 + $0x10] sm:$0xff]  ;;  %v319_v60 = vld [vmem:[%s2714_s1 + $0x40] sm:$0xff]  ;;  %v2133_v61 = vld [vmem:[%s2715_s2 + $0xf8] sm:$0xff] }
  0x29   : > { %395 = vmatpush1.msra.mxu0 %v329_v26  ;;  %1560 = vmatpush3.msra.mxu1 %v337_v34  ;;  %v2139_v62 = vld [vmem:[%s2715_s2 + $0xf0] sm:$0xff]  ;;  %v2146_v63 = vld [vmem:[%s2715_s2 + $0xe0] sm:$0xff]  ;;  %v2149_v0 = vld [vmem:[%s1920_s9 + $0x18] sm:$0xff] }
  0x2a   : > { %396 = vmatprep.subr.mxu0 %v327_v27  ;;  %1561 = vmatprep.subr.mxu1 %v334_v37  ;;  %v2155_v1 = vld [vmem:[%s2715_s2 + $0xd8] sm:$0xff]  ;;  %v316_v2 = vld [vmem:[%s2714_s1 + $0x28] sm:$0xff]  ;;  %v2171_v4 = vld [vmem:[%s2715_s2 + $0xc0] sm:$0xff] }
  0x2b   : > { %397 = vmatpush1.msra.mxu0 %v326_v29  ;;  %1562 = vmatpush3.msra.mxu1 %v334_v37  ;;  %v2165_v3 = vld [vmem:[%s2715_s2 + $0xc8] sm:$0xff]  ;;  %v313_v6 = vld [vmem:[%s2714_s1 + $0x10] sm:$0xff]  ;;  %v2193_v9 = vld [vmem:[%s2715_s2 + $0x98] sm:$0xff] }
  0x2c   : > { %398 = vmatprep.subr.mxu0 %v324_v30  ;;  %1563 = vmatprep.subr.mxu1 %v331_v40  ;;  %v2181_v7 = vld [vmem:[%s2715_s2 + $0xb0] sm:$0xff]  ;;  %v2187_v8 = vld [vmem:[%s2715_s2 + $0xa8] sm:$0xff]  ;;  %v2205_v11 = vld [vmem:[%s2715_s2 + $0x80] sm:$0xff] }
  0x2d   : > { %399 = vmatpush1.msra.mxu0 %v323_v32  ;;  %1564 = vmatpush3.msra.mxu1 %v331_v40  ;;  %v2199_v10 = vld [vmem:[%s2715_s2 + $0x90] sm:$0xff]  ;;  %v2212_v12 = vld [vmem:[%s2715_s2 + $0x78] sm:$0xff]  ;;  %v2224_v14 = vld [vmem:[%s2715_s2 + $0x68] sm:$0xff]  ;;  %v361_v40 = vlaneseq }
  0x2e   : > { %400 = vmatprep.subr.mxu0 %v321_v33  ;;  %1565 = vmatprep.subr.mxu1 %v328_v43  ;;  %v2218_v13 = vld [vmem:[%s2715_s2 + $0x178] sm:$0xff]  ;;  %v2230_v15 = vld [vmem:[%s2715_s2 + $0x60] sm:$0xff]  ;;  %v2242_v17 = vld [vmem:[%s2715_s2 + $0x50] sm:$0xff] }
  0x2f   : > { %401 = vmatpush1.msra.mxu0 %v320_v35  ;;  %1566 = vmatpush3.msra.mxu1 %v328_v43  ;;  %v2236_v16 = vld [vmem:[%s2715_s2 + $0x160] sm:$0xff]  ;;  %v2249_v18 = vld [vmem:[%s2715_s2 + $0x48] sm:$0xff]  ;;  %v2261_v20 = vld [vmem:[%s2715_s2 + $0x38] sm:$0xff] }
  0x30   : > { %402 = vmatprep.subr.mxu0 %v318_v36  ;;  %1567 = vmatprep.subr.mxu1 %v325_v49  ;;  %v2255_v19 = vld [vmem:[%s2715_s2 + $0x148] sm:$0xff]  ;;  %v2268_v21 = vld [vmem:[%s2715_s2 + $0x30] sm:$0xff]  ;;  %v2280_v23 = vld [vmem:[%s2715_s2 + $0x20] sm:$0xff] }
  0x31   : > { %403 = vmatpush1.msra.mxu0 %v317_v38  ;;  %1568 = vmatpush3.msra.mxu1 %v325_v49  ;;  %v2274_v22 = vld [vmem:[%s2715_s2 + $0x130] sm:$0xff]  ;;  %2739 = vst [vmem:[#allocation4_spill] sm:$0xff] %v2280_v23  ;;  %v2287_v24 = vld [vmem:[%s2715_s2 + $0x18] sm:$0xff]  ;;  %v2299_v26 = vld [vmem:[%s2715_s2 + $0x8] sm:$0xff] }
  0x32   : > { %404 = vmatprep.subr.mxu0 %v315_v39  ;;  %1569 = vmatprep.subr.mxu1 %v322_v55  ;;  %2740 = vst [vmem:[#allocation5_spill] sm:$0xff] %v2287_v24  ;;  %v2293_v25 = vld [vmem:[%s2715_s2 + $0x118] sm:$0xff]  ;;  %2741 = vst [vmem:[#allocation6_spill] sm:$0xff] %v2299_v26  ;;  %v2306_v27 = vld [vmem:[%s2715_s2] sm:$0xff] }
  0x33   : > { %405 = vmatpush1.msra.mxu0 %v314_v41  ;;  %1570 = vmatpush3.msra.mxu1 %v322_v55  ;;  %2742 = vst [vmem:[#allocation7_spill] sm:$0xff] %v2306_v27  ;;  %v2312_v28 = vld [vmem:[%s2715_s2 + $0x100] sm:$0xff]  ;;  %v2323_v30 = vld [vmem:[%s2715_s2 + $0xe8] sm:$0xff]  ;;  %v2332_v31 = vld [vmem:[%s2715_s2 + $0xd0] sm:$0xff]  ;;  %v362_v41 = vshrl.u32 %v361_v40, 7 }
  0x34   : > { %406 = vmatprep.subr.mxu0 %v312_v42  ;;  %1571 = vmatprep.subr.mxu1 %v319_v60  ;;  %v2315_v29 = vld [vmem:[#allocation2] sm:$0xff]  ;;  %v2340_v32 = vld [vmem:[%s2715_s2 + $0xb8] sm:$0xff]  ;;  %v2359_v34 = vld [vmem:[%s2715_s2 + $0x88] sm:$0xff] }
  0x35   : > { %407 = vmatpush1.msra.mxu0 %v311_v44  ;;  %1572 = vmatpush3.msra.mxu1 %v319_v60  ;;  %v2350_v33 = vld [vmem:[%s2715_s2 + $0xa0] sm:$0xff]  ;;  %v2368_v35 = vld [vmem:[%s2715_s2 + $0x70] sm:$0xff]  ;;  %v2377_v36 = vld [vmem:[%s2715_s2 + $0x58] sm:$0xff]  ;;  %v363_v42 = vsub.s32 0, %v362_v41 }
  0x36   : > { %441 = vmatmul.mubr.f32.vlgmr.msra.gmra.mxu0 %v2054_v45  ;;  %606 = vmatprep.subr.mxu0 %v2059_v46  ;;  %v2386_v37 = vld [vmem:[%s2715_s2 + $0x40] sm:$0xff]  ;;  %v2395_v38 = vld [vmem:[%s2715_s2 + $0x28] sm:$0xff]  ;;  %v2404_v39 = vld [vmem:[%s2715_s2 + $0x10] sm:$0xff] }
  0x37   : > { %607 = vmatpush1.msra.mxu0 %v2064_v47  ;;  %446 = vmatprep.mubr.f32.mxu0 %v2721_v5  ;;  %2743 = vst [vmem:[#allocation8_spill] sm:$0xff] %v2386_v37  ;;  %2744 = vst [vmem:[#allocation9_spill] sm:$0xff] %v2395_v38  ;;  %v359_v43 = vld [vmem:[%s2716_s3] sm:$0x7] }
  0x38   : > { %608 = vmatprep.subr.mxu0 %v2069_v48  ;;  %1573 = vmatprep.subr.mxu1 %v316_v2  ;;  %2745 = vst [vmem:[#allocation10_spill] sm:$0xff] %v2404_v39 }
  0x39   : > { %609 = vmatpush1.msra.mxu0 %v2079_v50  ;;  %1574 = vmatpush3.msra.mxu1 %v316_v2 }
  0x3a   : > { %610 = vmatprep.subr.mxu0 %v2085_v51  ;;  %447 = vmatmul.mubr.f32.gmra.mxu0 %v308_v52 }
  0x3b   : > { %611 = vmatpush1.msra.mxu0 %v2093_v53  ;;  %452 = vmatprep.mubr.f32.mxu0 %v2721_v5 }
  0x3c   : > { %612 = vmatprep.subr.mxu0 %v2099_v54  ;;  %1575 = vmatprep.subr.mxu1 %v313_v6 }
  0x3d   : > { %613 = vmatpush1.msra.mxu0 %v2108_v56  ;;  %1576 = vmatpush3.msra.mxu1 %v313_v6 }
  0x3e   : > { %614 = vmatprep.subr.mxu0 %v2114_v57  ;;  %453 = vmatmul.mubr.f32.gmra.mxu0 %v2118_v58 }
  0x3f   : > { %615 = vmatpush1.msra.mxu0 %v2124_v59  ;;  %458 = vmatprep.mubr.f32.mxu0 %v2721_v5 }
  0x40   : > { %616 = vmatprep.subr.mxu0 %v2133_v61  ;;  %1577 = vmatprep.mubr.f32.mxu1 %v2054_v45  ;;  %v367_v45 = vsub.s32 1, %v362_v41 }
  0x41   : > { %617 = vmatpush1.msra.mxu0 %v2139_v62  ;;  %1583 = vmatprep.subr.mxu1 %v2721_v5 }
  0x42   : > { %618 = vmatprep.subr.mxu0 %v2146_v63  ;;  %459 = vmatmul.mubr.f32.gmra.mxu0 %v2149_v0 }
  0x43   : > { %619 = vmatpush1.msra.mxu0 %v2155_v1  ;;  %1578 = vmatmul.mubr.f32.vlgmr.msra.gmra.mxu1 %v308_v52  ;;  %v364_v52 = vrot.slane %v359_v43, %v363_v42 }
  0x44   : > { %620 = vmatprep.subr.mxu0 %v2165_v3  ;;  %670 = vmatprep.mubr.f32.mxu0 %v2721_v5 }
  0x45   : > { %621 = vmatpush1.msra.mxu0 %v2171_v4  ;;  %1584 = vmatpush3.msra.mxu1 %v2218_v13 }
  0x46   : > { %622 = vmatprep.subr.mxu0 %v2181_v7  ;;  %1585 = vmatprep.subr.mxu1 %v2721_v5 }
  0x47   : > { %623 = vmatpush1.msra.mxu0 %v2187_v8  ;;  %1586 = vmatpush3.msra.mxu1 %v2236_v16 }
  0x48   : > { %624 = vmatprep.subr.mxu0 %v2193_v9  ;;  %1587 = vmatprep.subr.mxu1 %v2721_v5 }
  0x49   : > { %625 = vmatpush1.msra.mxu0 %v2199_v10  ;;  %1588 = vmatpush3.msra.mxu1 %v2255_v19 }
  0x4a   : > { %626 = vmatprep.subr.mxu0 %v2205_v11  ;;  %1589 = vmatprep.subr.mxu1 %v2721_v5 }
  0x4b   : > { %627 = vmatpush1.msra.mxu0 %v2212_v12  ;;  %1590 = vmatpush3.msra.mxu1 %v2274_v22 }
  0x4c   : > { %628 = vmatprep.subr.mxu0 %v2224_v14  ;;  %1591 = vmatprep.subr.mxu1 %v2721_v5 }
  0x4d   : > { %629 = vmatpush1.msra.mxu0 %v2230_v15  ;;  %1592 = vmatpush3.msra.mxu1 %v2293_v25 }
  0x4e   : > { %630 = vmatprep.subr.mxu0 %v2242_v17  ;;  %1593 = vmatprep.subr.mxu1 %v2721_v5 }
  0x4f   : > { %631 = vmatpush1.msra.mxu0 %v2249_v18  ;;  %1594 = vmatpush3.msra.mxu1 %v2312_v28 }
  0x50   : > { %632 = vmatprep.subr.mxu0 %v2261_v20  ;;  %1595 = vmatprep.subr.mxu1 %v2721_v5 }
  0x51   : > { %633 = vmatpush1.msra.mxu0 %v2268_v21  ;;  %1596 = vmatpush3.msra.mxu1 %v2323_v30 }
  0x52   : > { %634 = vmatprep.subr.mxu0 %v2280_v23  ;;  %1580 = vmatprep.mubr.f32.mxu1 %v2118_v58  ;;  %v368_v58 = vrot.slane %v359_v43, %v367_v45 }
  0x53   : > { %635 = vmatpush1.msra.mxu0 %v2287_v24  ;;  %1597 = vmatprep.subr.mxu1 %v2721_v5 }
  0x54   : > { %636 = vmatprep.subr.mxu0 %v2299_v26  ;;  %1581 = vmatmul.mubr.f32.gmra.mxu1 %v2149_v0 }
  0x55   : > { %637 = vmatpush1.msra.mxu0 %v2306_v27  ;;  %1598 = vmatpush3.msra.mxu1 %v2332_v31 }
  0x56   : > { %671 = vmatmul.mubr.f32.vlgmr.msra.gmra.mxu0 %v2315_v29  ;;  %1615 = vmatprep.mubr.msk.f32.mxu1 %vm1853_vm0, %v2721_v5 }
  0x57   : > { %1599 = vmatprep.subr.mxu1 %v2721_v5  ;;  %769 = vmatprep.subr.mxu0 %v2059_v46 }
  0x58   : > { %1600 = vmatpush3.msra.mxu1 %v2340_v32  ;;  %770 = vmatpush1.msra.mxu0 %v2064_v47 }
  0x59   : > { %1601 = vmatprep.subr.mxu1 %v2721_v5  ;;  %771 = vmatprep.subr.mxu0 %v2069_v48 }
  0x5a   : > { %1602 = vmatpush3.msra.mxu1 %v2350_v33  ;;  %772 = vmatpush1.msra.mxu0 %v2079_v50 }
  0x5b   : > { %1603 = vmatprep.subr.mxu1 %v2721_v5  ;;  %773 = vmatprep.subr.mxu0 %v2085_v51 }
  0x5c   : > { %1604 = vmatpush3.msra.mxu1 %v2359_v34  ;;  %774 = vmatpush1.msra.mxu0 %v2093_v53 }
  0x5d   : > { %1605 = vmatprep.subr.mxu1 %v2721_v5  ;;  %775 = vmatprep.subr.mxu0 %v2099_v54 }
  0x5e   : > { %1606 = vmatpush3.msra.mxu1 %v2368_v35  ;;  %776 = vmatpush1.msra.mxu0 %v2108_v56 }
  0x5f   : > { %1607 = vmatprep.subr.mxu1 %v2721_v5  ;;  %777 = vmatprep.subr.mxu0 %v2114_v57 }
  0x60   : > { %1608 = vmatpush3.msra.mxu1 %v2377_v36  ;;  %778 = vmatpush1.msra.mxu0 %v2124_v59 }
  0x61   : > { %1609 = vmatprep.subr.mxu1 %v2721_v5  ;;  %779 = vmatprep.subr.mxu0 %v2133_v61 }
  0x62   : > { %1610 = vmatpush3.msra.mxu1 %v2386_v37  ;;  %780 = vmatpush1.msra.mxu0 %v2139_v62 }
  0x63   : > { %1611 = vmatprep.subr.mxu1 %v2721_v5  ;;  %781 = vmatprep.subr.mxu0 %v2146_v63 }
  0x64   : > { %1612 = vmatpush3.msra.mxu1 %v2395_v38  ;;  %782 = vmatpush1.msra.mxu0 %v2155_v1 }
  0x65   : > { %1613 = vmatprep.subr.mxu1 %v2721_v5  ;;  %783 = vmatprep.subr.mxu0 %v2165_v3 }
  0x66   : > { %1614 = vmatpush3.msra.mxu1 %v2404_v39  ;;  %784 = vmatpush1.msra.mxu0 %v2171_v4 }
  0x67   : > { %1616 = vmatmul.mubr.f32.vlgmr.msra.gmra.mxu1 %v2315_v29  ;;  %1618 = vmatprep.subr.mxu1 %v2721_v5 }
  0x68   : > { %1619 = vmatpush3.msra.mxu1 %v2218_v13  ;;  %785 = vmatprep.subr.mxu0 %v2181_v7 }
  0x69   : > { %1620 = vmatprep.subr.mxu1 %v2721_v5  ;;  %786 = vmatpush1.msra.mxu0 %v2187_v8 }
  0x6a   : > { %1621 = vmatpush3.msra.mxu1 %v2236_v16  ;;  %787 = vmatprep.subr.mxu0 %v2193_v9 }
  0x6b   : > { %1622 = vmatprep.subr.mxu1 %v2721_v5  ;;  %788 = vmatpush1.msra.mxu0 %v2199_v10 }
  0x6c   : > { %1623 = vmatpush3.msra.mxu1 %v2255_v19  ;;  %789 = vmatprep.subr.mxu0 %v2205_v11 }
  0x6d   : > { %1624 = vmatprep.subr.mxu1 %v2721_v5  ;;  %790 = vmatpush1.msra.mxu0 %v2212_v12 }
  0x6e   : > { %1625 = vmatpush3.msra.mxu1 %v2274_v22  ;;  %791 = vmatprep.subr.mxu0 %v2224_v14 }
  0x6f   : > { %1626 = vmatprep.subr.mxu1 %v2721_v5  ;;  %792 = vmatpush1.msra.mxu0 %v2230_v15 }
  0x70   : > { %1627 = vmatpush3.msra.mxu1 %v2293_v25  ;;  %793 = vmatprep.subr.mxu0 %v2242_v17 }
  0x71   : > { %1628 = vmatprep.subr.mxu1 %v2721_v5  ;;  %794 = vmatpush1.msra.mxu0 %v2249_v18 }
  0x72   : > { %1629 = vmatpush3.msra.mxu1 %v2312_v28  ;;  %795 = vmatprep.subr.mxu0 %v2261_v20 }
  0x73   : > { %1630 = vmatprep.subr.mxu1 %v2721_v5  ;;  %796 = vmatpush1.msra.mxu0 %v2268_v21 }
  0x74   : > { %1631 = vmatpush3.msra.mxu1 %v2323_v30  ;;  %797 = vmatprep.subr.mxu0 %v2280_v23 }
  0x75   : > { %1632 = vmatprep.subr.mxu1 %v2721_v5  ;;  %798 = vmatpush1.msra.mxu0 %v2287_v24 }
  0x76   : > { %1633 = vmatpush3.msra.mxu1 %v2332_v31  ;;  %799 = vmatprep.subr.mxu0 %v2299_v26 }
  0x77   : > { %1634 = vmatprep.subr.mxu1 %v2721_v5  ;;  %800 = vmatpush1.msra.mxu0 %v2306_v27  ;;  %v371_v27 = vsub.s32 2, %v362_v41 }
  0x78   : > { %1635 = vmatpush3.msra.mxu1 %v2340_v32  ;;  %833 = vmatprep.mubr.f32.mxu0 %v2721_v5 }
  0x79   : > { %1636 = vmatprep.subr.mxu1 %v2721_v5  ;;  %1650 = vmatprep.mubr.msk.f32.mxu1 %vm1853_vm0, %v2721_v5  ;;  %v372_v42 = vrot.slane %v359_v43, %v371_v27 }
  0x7a   : > { %1637 = vmatpush3.msra.mxu1 %v2350_v33  ;;  %932 = vmatprep.subr.mxu0 %v2059_v46 }
  0x7b   : > { %1638 = vmatprep.subr.mxu1 %v2721_v5 }
  0x7c   : > { %1639 = vmatpush3.msra.mxu1 %v2359_v34 }
  0x7d   : > { %1640 = vmatprep.subr.mxu1 %v2721_v5 }
  0x7e   : > { %1641 = vmatpush3.msra.mxu1 %v2368_v35 }
  0x7f   : > { %1642 = vmatprep.subr.mxu1 %v2721_v5 }
  0x80   : > { %1643 = vmatpush3.msra.mxu1 %v2377_v36 }
  0x81   : > { %1644 = vmatprep.subr.mxu1 %v2721_v5 }
  0x82   : > { %1645 = vmatpush3.msra.mxu1 %v2386_v37 }
  0x83   : > { %1646 = vmatprep.subr.mxu1 %v2721_v5 }
  0x84   : > { %1647 = vmatpush3.msra.mxu1 %v2395_v38 }
  0x85   : > { %1648 = vmatprep.subr.mxu1 %v2721_v5 }
  0x86   : > { %1649 = vmatpush3.msra.mxu1 %v2404_v39 }
  0x87   : > { %1653 = vmatprep.subr.mxu1 %v2721_v5 }
  0xf6   : > { %v442_v44 = vpop.f32.mrf.mxu0 }
  0xf8   : > { %v444_v49 = vpop.f32.mrf.mxu0 }
  0xf9   : > { %v445_v41 = vadd.f32 %v444_v49, %v368_v58 }
  0xfa   : > { %v448_v55 = vpop.f32.mrf.mxu0 }
  0xfb   : > { %v2470_v60 = vadd.f32 %v448_v55, %v364_v52 }
  0xfc   : > { %v450_v0 = vpop.f32.mrf.mxu0 }
  0xfd   : > { %2746 = vst [vmem:[#allocation11_spill] sm:$0xff] %v2470_v60  ;;  %v2472_v2 = vadd.f32 %v450_v0, %v368_v58  ;;  %v443_v60 = vadd.f32 %v442_v44, %v364_v52 }
  0xfe   : > { %v454_v6 = vpop.f32.mrf.mxu0 }
  0xff   : > { %2747 = vst [vmem:[#allocation12_spill] sm:$0xff] %v2472_v2  ;;  %v2474_v5 = vadd.f32 %v454_v6, %v364_v52 }
 0x100   : > { %v456_v40 = vpop.f32.mrf.mxu0 }
 0x101   : > { %2748 = vst [vmem:[#allocation13_spill] sm:$0xff] %v2474_v5  ;;  %v2476_v46 = vadd.f32 %v456_v40, %v368_v58 }
 0x102   : > { %v460_v39 = vpop.f32.mrf.mxu0 }
 0x103   : > { %2749 = vst [vmem:[#allocation14_spill] sm:$0xff] %v2476_v46  ;;  %v2478_v26 = vadd.f32 %v460_v39, %v364_v52  ;;  %v1579_v45 = vpop.f32.mrf.mxu1 }
 0x104   : > { %v462_v38 = vpop.f32.mrf.mxu0  ;;  %v2482_v55 = vadd.f32 %v1579_v45, %v372_v42 }
 0x105   : > { %2750 = vst [vmem:[#allocation15_spill] sm:$0xff] %v2478_v26  ;;  %v2480_v24 = vadd.f32 %v462_v38, %v368_v58  ;;  %v531_v2 = vpop.f32.mrf.mxu1 }
 0x107   : > { %2751 = vst [vmem:[#allocation16_spill] sm:$0xff] %v2480_v24 }
 0x114   : > { %v1582_v6 = vpop.f32.mrf.mxu1 }
 0x115   : > { %v2484_v37 = vadd.f32 %v1582_v6, %v372_v42 }
 0x116   : > { %v672_v0 = vpop.f32.mrf.mxu0  ;;  %v541_v46 = vpop.f32.mrf.mxu1 }
 0x117   : > { %v747_v23 = vadd.f32 %v672_v0, %v443_v60  ;;  %2752 = vst [vmem:[#allocation17_spill] sm:$0xff] %v2484_v37  ;;  %v2486_v39 = vadd.f32 %v541_v46, %v372_v42  ;;  %v532_v46 = vadd.f32 %v531_v2, %v372_v42  ;;  %v2754_v2 = vmov 0.0   ;;  %v2756_v42 = vld [vmem:[#allocation4_spill] sm:$0xff] }
 0x118   : > { %v674_v40 = vpop.f32.mrf.mxu0 }
 0x119   : > { %v1427_v5 = vmul.f32 -1.442695, %v747_v23  ;;  %2753 = vst [vmem:[#allocation18_spill] sm:$0xff] %v2486_v39  ;;  %v754_v38 = vadd.f32 %v674_v40, %v445_v41  ;;  %v2491_v23 = vld [vmem:[%s2717_s4] ss:$0 sm:$0xff] }
 0x11b   : > { %1787 = vpow2.f32 %v1427_v5  ;;  %v1428_v24 = vmul.f32 -1.442695, %v754_v38 }
 0x11d   : > { %1789 = vpow2.f32 %v1428_v24 }
 0x127   : > { %v743_v45 = vpop.f32.mrf.mxu1 }
 0x128   : > { %v1788_v27 = vpop.eup %1787  ;;  %v761_v49 = vadd.f32 %v2491_v23, %v743_v45  ;;  %v2758_v45 = vld [vmem:[#allocation9_spill] sm:$0xff] }
 0x129   : > { %v751_v43 = vadd.f32 1.0, %v1788_v27  ;;  %v1617_v44 = vpop.f32.mrf.mxu1 }
 0x12a   : > { %v1790_v52 = vpop.eup %1789  ;;  %v2759_v44 = vld [vmem:[#allocation6_spill] sm:$0xff] }
 0x12b   : > { %1791 = vrcp.f32 %v751_v43  ;;  %v758_v60 = vadd.f32 1.0, %v1790_v52  ;;  %v2757_v43 = vld [vmem:[#allocation5_spill] sm:$0xff]  ;;  %v2760_v52 = vld [vmem:[#allocation7_spill] sm:$0xff] }
 0x12d   : > { %1793 = vrcp.f32 %v758_v60  ;;  %v2761_v60 = vld [vmem:[#allocation10_spill] sm:$0xff] }
 0x138   : > { %v1792_v5 = vpop.eup %1791 }
 0x139   : > { %v762_v58 = vmul.f32 %v1792_v5, %v761_v49  ;;  %v2762_v49 = vld [vmem:[#allocation3_spill] sm:$0xff] }
 0x13a   : > { %v1794_v24 = vpop.eup %1793 }
 0x13b   : > { %v763_v0 = vadd.f32 %v762_v58, %v532_v46  ;;  %v765_v6 = vsub.f32 1.0, %v1794_v24  ;;  %v767_v38 = vmul.f32 %v1794_v24, %v2315_v29  ;;  %v2755_v29 = vld [vmem:[#allocation8_spill] sm:$0xff]  ;;  %v2763_v58 = vld [vmem:[#allocation11_spill] sm:$0xff] }
 0x13d   : > { %1795 = vtanh.f32 %v763_v0 }
 0x14a   : > { %v1796_v40 = vpop.eup %1795 }
 0x14b   : > { %v766_v41 = vmul.f32 %v1796_v40, %v765_v6 }
 0x14d   : > { %v2495_v27 = vadd.f32 %v767_v38, %v766_v41  ;;  %v2764_v41 = vld [vmem:[#allocation12_spill] sm:$0xff] }
 0x14f   : > { %834 = vmatmul.mubr.f32.vlgmr.msra.gmra.mxu0 %v2495_v27  ;;  %1651 = vmatmul.mubr.f32.vlgmr.msra.gmra.mxu1 %v2495_v27 }
 0x150   : > { %933 = vmatpush1.msra.mxu0 %v2064_v47  ;;  %1654 = vmatpush3.msra.mxu1 %v2218_v13 }
 0x151   : > { %934 = vmatprep.subr.mxu0 %v2069_v48  ;;  %1655 = vmatprep.subr.mxu1 %v2754_v2 }
 0x152   : > { %935 = vmatpush1.msra.mxu0 %v2079_v50  ;;  %1656 = vmatpush3.msra.mxu1 %v2236_v16 }
 0x153   : > { %936 = vmatprep.subr.mxu0 %v2085_v51  ;;  %1657 = vmatprep.subr.mxu1 %v2754_v2 }
 0x154   : > { %937 = vmatpush1.msra.mxu0 %v2093_v53  ;;  %1658 = vmatpush3.msra.mxu1 %v2255_v19 }
 0x155   : > { %938 = vmatprep.subr.mxu0 %v2099_v54  ;;  %1659 = vmatprep.subr.mxu1 %v2754_v2 }
 0x156   : > { %939 = vmatpush1.msra.mxu0 %v2108_v56  ;;  %1660 = vmatpush3.msra.mxu1 %v2274_v22 }
 0x157   : > { %940 = vmatprep.subr.mxu0 %v2114_v57  ;;  %1661 = vmatprep.subr.mxu1 %v2754_v2 }
 0x158   : > { %941 = vmatpush1.msra.mxu0 %v2124_v59  ;;  %1662 = vmatpush3.msra.mxu1 %v2293_v25 }
 0x159   : > { %942 = vmatprep.subr.mxu0 %v2133_v61  ;;  %1663 = vmatprep.subr.mxu1 %v2754_v2 }
 0x15a   : > { %943 = vmatpush1.msra.mxu0 %v2139_v62  ;;  %1664 = vmatpush3.msra.mxu1 %v2312_v28 }
 0x15b   : > { %944 = vmatprep.subr.mxu0 %v2146_v63  ;;  %1665 = vmatprep.subr.mxu1 %v2754_v2 }
 0x15c   : > { %945 = vmatpush1.msra.mxu0 %v2155_v1  ;;  %1666 = vmatpush3.msra.mxu1 %v2323_v30 }
 0x15d   : > { %946 = vmatprep.subr.mxu0 %v2165_v3  ;;  %1667 = vmatprep.subr.mxu1 %v2754_v2 }
 0x15e   : > { %947 = vmatpush1.msra.mxu0 %v2171_v4  ;;  %1668 = vmatpush3.msra.mxu1 %v2332_v31 }
 0x15f   : > { %948 = vmatprep.subr.mxu0 %v2181_v7  ;;  %1669 = vmatprep.subr.mxu1 %v2754_v2 }
 0x160   : > { %949 = vmatpush1.msra.mxu0 %v2187_v8  ;;  %1670 = vmatpush3.msra.mxu1 %v2340_v32 }
 0x161   : > { %950 = vmatprep.subr.mxu0 %v2193_v9  ;;  %1671 = vmatprep.subr.mxu1 %v2754_v2 }
 0x162   : > { %951 = vmatpush1.msra.mxu0 %v2199_v10  ;;  %1672 = vmatpush3.msra.mxu1 %v2350_v33 }
 0x163   : > { %952 = vmatprep.subr.mxu0 %v2205_v11  ;;  %1673 = vmatprep.subr.mxu1 %v2754_v2 }
 0x164   : > { %953 = vmatpush1.msra.mxu0 %v2212_v12  ;;  %1674 = vmatpush3.msra.mxu1 %v2359_v34 }
 0x165   : > { %954 = vmatprep.subr.mxu0 %v2224_v14  ;;  %1675 = vmatprep.subr.mxu1 %v2754_v2 }
 0x166   : > { %955 = vmatpush1.msra.mxu0 %v2230_v15  ;;  %1676 = vmatpush3.msra.mxu1 %v2368_v35 }
 0x167   : > { %956 = vmatprep.subr.mxu0 %v2242_v17  ;;  %1677 = vmatprep.subr.mxu1 %v2754_v2 }
 0x168   : > { %957 = vmatpush1.msra.mxu0 %v2249_v18  ;;  %1678 = vmatpush3.msra.mxu1 %v2377_v36 }
 0x169   : > { %958 = vmatprep.subr.mxu0 %v2261_v20  ;;  %1679 = vmatprep.subr.mxu1 %v2754_v2 }
 0x16a   : > { %959 = vmatpush1.msra.mxu0 %v2268_v21  ;;  %1680 = vmatpush3.msra.mxu1 %v2755_v29 }
 0x16b   : > { %960 = vmatprep.subr.mxu0 %v2756_v42  ;;  %1681 = vmatprep.subr.mxu1 %v2754_v2 }
 0x16c   : > { %961 = vmatpush1.msra.mxu0 %v2757_v43  ;;  %1682 = vmatpush3.msra.mxu1 %v2758_v45 }
 0x16d   : > { %962 = vmatprep.subr.mxu0 %v2759_v44  ;;  %1683 = vmatprep.subr.mxu1 %v2754_v2 }
 0x16e   : > { %963 = vmatpush1.msra.mxu0 %v2760_v52  ;;  %996 = vmatprep.mubr.f32.mxu0 %v2754_v2 }
 0x16f   : > { %1684 = vmatpush3.msra.mxu1 %v2761_v60  ;;  %1685 = vmatprep.mubr.msk.f32.mxu1 %vm1853_vm0, %v2754_v2 }
 0x170   : > { %1095 = vmatprep.subr.mxu0 %v2762_v49  ;;  %1688 = vmatprep.subr.mxu1 %v2754_v2 }
 0x20f   : > { %v835_v5 = vpop.f32.mrf.mxu0  ;;  %v906_v46 = vpop.f32.mrf.mxu1 }
 0x210   : > { %v910_v0 = vadd.f32 %v835_v5, %v2763_v58  ;;  %v924_v49 = vadd.f32 %v2491_v23, %v906_v46 }
 0x211   : > { %v1652_v24 = vpop.f32.mrf.mxu1  ;;  %v837_v40 = vpop.f32.mrf.mxu0 }
 0x212   : > { %v1429_v6 = vmul.f32 -1.442695, %v910_v0  ;;  %v917_v38 = vadd.f32 %v837_v40, %v2764_v41 }
 0x214   : > { %1797 = vpow2.f32 %v1429_v6  ;;  %v1430_v37 = vmul.f32 -1.442695, %v917_v38 }
 0x216   : > { %1799 = vpow2.f32 %v1430_v37 }
 0x221   : > { %v1798_v26 = vpop.eup %1797 }
 0x222   : > { %v914_v39 = vadd.f32 1.0, %v1798_v26 }
 0x223   : > { %v1800_v60 = vpop.eup %1799 }
 0x224   : > { %1801 = vrcp.f32 %v914_v39  ;;  %v921_v52 = vadd.f32 1.0, %v1800_v60 }
 0x226   : > { %1803 = vrcp.f32 %v921_v52 }
 0x231   : > { %v1802_v44 = vpop.eup %1801 }
 0x232   : > { %v925_v45 = vmul.f32 %v1802_v44, %v924_v49 }
 0x233   : > { %v1804_v58 = vpop.eup %1803 }
 0x234   : > { %v926_v5 = vadd.f32 %v925_v45, %v2482_v55  ;;  %v928_v0 = vsub.f32 1.0, %v1804_v58  ;;  %v930_v40 = vmul.f32 %v1804_v58, %v2495_v27 }
 0x236   : > { %1805 = vtanh.f32 %v926_v5 }
 0x243   : > { %v1806_v24 = vpop.eup %1805 }
 0x244   : > { %v929_v6 = vmul.f32 %v1806_v24, %v928_v0 }
 0x246   : > { %v2571_v37 = vadd.f32 %v930_v40, %v929_v6 }
 0x248   : > { %997 = vmatmul.mubr.f32.vlgmr.msra.gmra.mxu0 %v2571_v37  ;;  %1686 = vmatmul.mubr.f32.vlgmr.msra.gmra.mxu1 %v2571_v37 }
 0x249   : > { %1096 = vmatpush1.msra.mxu0 %v2064_v47  ;;  %1689 = vmatpush3.msra.mxu1 %v2218_v13  ;;  %v2765_v47 = vld [vmem:[#allocation9_spill] sm:$0xff]  ;;  %v2771_v13 = vld [vmem:[#allocation18_spill] sm:$0xff] }
 0x24a   : > { %1097 = vmatprep.subr.mxu0 %v2069_v48  ;;  %1690 = vmatprep.subr.mxu1 %v2754_v2  ;;  %v2766_v48 = vld [vmem:[#allocation6_spill] sm:$0xff] }
 0x24b   : > { %1098 = vmatpush1.msra.mxu0 %v2079_v50  ;;  %1691 = vmatpush3.msra.mxu1 %v2236_v16  ;;  %v2767_v50 = vld [vmem:[#allocation7_spill] sm:$0xff] }
 0x24c   : > { %1099 = vmatprep.subr.mxu0 %v2085_v51  ;;  %1692 = vmatprep.subr.mxu1 %v2754_v2  ;;  %v2768_v51 = vld [vmem:[#allocation10_spill] sm:$0xff] }
 0x24d   : > { %1100 = vmatpush1.msra.mxu0 %v2093_v53  ;;  %1693 = vmatpush3.msra.mxu1 %v2255_v19 }
 0x24e   : > { %1101 = vmatprep.subr.mxu0 %v2099_v54  ;;  %1694 = vmatprep.subr.mxu1 %v2754_v2 }
 0x24f   : > { %1102 = vmatpush1.msra.mxu0 %v2108_v56  ;;  %1695 = vmatpush3.msra.mxu1 %v2274_v22  ;;  %v2769_v56 = vld [vmem:[#allocation13_spill] sm:$0xff] }
 0x250   : > { %1103 = vmatprep.subr.mxu0 %v2114_v57  ;;  %1696 = vmatprep.subr.mxu1 %v2754_v2 }
 0x251   : > { %1104 = vmatpush1.msra.mxu0 %v2124_v59  ;;  %1697 = vmatpush3.msra.mxu1 %v2293_v25  ;;  %v2772_v25 = vld [vmem:[#allocation15_spill] sm:$0xff] }
 0x252   : > { %1105 = vmatprep.subr.mxu0 %v2133_v61  ;;  %1698 = vmatprep.subr.mxu1 %v2754_v2 }
 0x253   : > { %1106 = vmatpush1.msra.mxu0 %v2139_v62  ;;  %1699 = vmatpush3.msra.mxu1 %v2312_v28 }
 0x254   : > { %1107 = vmatprep.subr.mxu0 %v2146_v63  ;;  %1700 = vmatprep.subr.mxu1 %v2754_v2  ;;  %v2770_v63 = vld [vmem:[#allocation14_spill] sm:$0xff] }
 0x255   : > { %1108 = vmatpush1.msra.mxu0 %v2155_v1  ;;  %1701 = vmatpush3.msra.mxu1 %v2323_v30 }
 0x256   : > { %1109 = vmatprep.subr.mxu0 %v2165_v3  ;;  %1702 = vmatprep.subr.mxu1 %v2754_v2 }
 0x257   : > { %1110 = vmatpush1.msra.mxu0 %v2171_v4  ;;  %1703 = vmatpush3.msra.mxu1 %v2332_v31 }
 0x258   : > { %1111 = vmatprep.subr.mxu0 %v2181_v7  ;;  %1704 = vmatprep.subr.mxu1 %v2754_v2 }
 0x259   : > { %1112 = vmatpush1.msra.mxu0 %v2187_v8  ;;  %1705 = vmatpush3.msra.mxu1 %v2340_v32  ;;  %v2773_v32 = vld [vmem:[#allocation16_spill] sm:$0xff] }
 0x25a   : > { %1113 = vmatprep.subr.mxu0 %v2193_v9  ;;  %1706 = vmatprep.subr.mxu1 %v2754_v2 }
 0x25b   : > { %1114 = vmatpush1.msra.mxu0 %v2199_v10  ;;  %1707 = vmatpush3.msra.mxu1 %v2350_v33 }
 0x25c   : > { %1115 = vmatprep.subr.mxu0 %v2205_v11  ;;  %1708 = vmatprep.subr.mxu1 %v2754_v2 }
 0x25d   : > { %1116 = vmatpush1.msra.mxu0 %v2212_v12  ;;  %1709 = vmatpush3.msra.mxu1 %v2359_v34 }
 0x25e   : > { %1117 = vmatprep.subr.mxu0 %v2224_v14  ;;  %1710 = vmatprep.subr.mxu1 %v2754_v2 }
 0x25f   : > { %1118 = vmatpush1.msra.mxu0 %v2230_v15  ;;  %1711 = vmatpush3.msra.mxu1 %v2368_v35 }
 0x260   : > { %1119 = vmatprep.subr.mxu0 %v2242_v17  ;;  %1712 = vmatprep.subr.mxu1 %v2754_v2 }
 0x261   : > { %1120 = vmatpush1.msra.mxu0 %v2249_v18  ;;  %1713 = vmatpush3.msra.mxu1 %v2377_v36 }
 0x262   : > { %1121 = vmatprep.subr.mxu0 %v2261_v20  ;;  %1714 = vmatprep.subr.mxu1 %v2754_v2 }
 0x263   : > { %1122 = vmatpush1.msra.mxu0 %v2268_v21  ;;  %1715 = vmatpush3.msra.mxu1 %v2755_v29 }
 0x264   : > { %1123 = vmatprep.subr.mxu0 %v2756_v42  ;;  %1716 = vmatprep.subr.mxu1 %v2754_v2  ;;  %v2774_v42 = vld [vmem:[#allocation17_spill] sm:$0xff] }
 0x265   : > { %1124 = vmatpush1.msra.mxu0 %v2757_v43  ;;  %1717 = vmatpush3.msra.mxu1 %v2765_v47 }
 0x266   : > { %1125 = vmatprep.subr.mxu0 %v2766_v48  ;;  %1718 = vmatprep.subr.mxu1 %v2754_v2 }
 0x267   : > { %1126 = vmatpush1.msra.mxu0 %v2767_v50  ;;  %1159 = vmatprep.mubr.f32.mxu0 %v2754_v2 }
 0x268   : > { %1719 = vmatpush3.msra.mxu1 %v2768_v51  ;;  %1720 = vmatprep.mubr.msk.f32.mxu1 %vm1853_vm0, %v2754_v2 }
 0x308   : > { %v998_v53 = vpop.f32.mrf.mxu0  ;;  %v1069_v54 = vpop.f32.mrf.mxu1 }
 0x309   : > { %v1073_v57 = vadd.f32 %v998_v53, %v2769_v56  ;;  %v1087_v10 = vadd.f32 %v2491_v23, %v1069_v54 }
 0x30a   : > { %v1687_v59 = vpop.f32.mrf.mxu1  ;;  %v1000_v62 = vpop.f32.mrf.mxu0 }
 0x30b   : > { %v1431_v61 = vmul.f32 -1.442695, %v1073_v57  ;;  %v1080_v1 = vadd.f32 %v1000_v62, %v2770_v63 }
 0x30d   : > { %1807 = vpow2.f32 %v1431_v61  ;;  %v1432_v3 = vmul.f32 -1.442695, %v1080_v1 }
 0x30f   : > { %1809 = vpow2.f32 %v1432_v3 }
 0x31a   : > { %v1808_v4 = vpop.eup %1807 }
 0x31b   : > { %v1077_v7 = vadd.f32 1.0, %v1808_v4 }
 0x31c   : > { %v1810_v8 = vpop.eup %1809 }
 0x31d   : > { %1811 = vrcp.f32 %v1077_v7  ;;  %v1084_v9 = vadd.f32 1.0, %v1810_v8 }
 0x31f   : > { %1813 = vrcp.f32 %v1084_v9 }
 0x32a   : > { %v1812_v11 = vpop.eup %1811 }
 0x32b   : > { %v1088_v12 = vmul.f32 %v1812_v11, %v1087_v10 }
 0x32c   : > { %v1814_v15 = vpop.eup %1813 }
 0x32d   : > { %v1089_v14 = vadd.f32 %v1088_v12, %v2771_v13  ;;  %v1091_v16 = vsub.f32 1.0, %v1814_v15  ;;  %v1093_v19 = vmul.f32 %v1814_v15, %v2571_v37 }
 0x32f   : > { %1815 = vtanh.f32 %v1089_v14 }
 0x33c   : > { %v1816_v17 = vpop.eup %1815 }
 0x33d   : > { %v1092_v18 = vmul.f32 %v1816_v17, %v1091_v16 }
 0x33f   : > { %v1094_v20 = vadd.f32 %v1093_v19, %v1092_v18 }
 0x341   : > { %1160 = vmatmul.mubr.f32.vlgmr.msra.gmra.mxu0 %v1094_v20  ;;  %1721 = vmatmul.mubr.f32.vlgmr.msra.gmra.mxu1 %v1094_v20 }
 0x401   : > { %v1161_v21 = vpop.f32.mrf.mxu0  ;;  %v1232_v22 = vpop.f32.mrf.mxu1 }
 0x402   : > { %v1236_v26 = vadd.f32 %v1161_v21, %v2772_v25  ;;  %v1250_v27 = vadd.f32 %v2491_v23, %v1232_v22 }
 0x403   : > { %v1722_v28 = vpop.f32.mrf.mxu1  ;;  %v1163_v31 = vpop.f32.mrf.mxu0 }
 0x404   : > { %v1433_v30 = vmul.f32 -1.442695, %v1236_v26  ;;  %v1243_v33 = vadd.f32 %v1163_v31, %v2773_v32 }
 0x406   : > { %1817 = vpow2.f32 %v1433_v30  ;;  %v1434_v34 = vmul.f32 -1.442695, %v1243_v33 }
 0x408   : > { %1819 = vpow2.f32 %v1434_v34 }
 0x413   : > { %v1818_v35 = vpop.eup %1817 }
 0x414   : > { %v1240_v36 = vadd.f32 1.0, %v1818_v35 }
 0x415   : > { %v1820_v55 = vpop.eup %1819 }
 0x416   : > { %1821 = vrcp.f32 %v1240_v36  ;;  %v1247_v39 = vadd.f32 1.0, %v1820_v55 }
 0x418   : > { %1823 = vrcp.f32 %v1247_v39 }
 0x423   : > { %v1822_v2 = vpop.eup %1821 }
 0x424   : > { %v1251_v29 = vmul.f32 %v1822_v2, %v1250_v27 }
 0x425   : > { %v1824_v45 = vpop.eup %1823 }
 0x426   : > { %v1252_v43 = vadd.f32 %v1251_v29, %v2774_v42  ;;  %v1254_v44 = vsub.f32 1.0, %v1824_v45  ;;  %v1256_v46 = vmul.f32 %v1824_v45, %v1094_v20 }
 0x428   : > { %1825 = vtanh.f32 %v1252_v43 }
 0x435   : > { %v1826_v52 = vpop.eup %1825 }
 0x436   : > { %v1255_v60 = vmul.f32 %v1826_v52, %v1254_v44  ;;  %1262 = sbr.rel (%p1435_p6) target bundleno = 1312 (0x520), region = 56 }
 0x438   : > { %v1257_v41 = vadd.f32 %v1256_v46, %v1255_v60 }
 0x43a   : > { %1258 = vst [vmem:[#allocation2] sm:$0xff] %v1257_v41 }
 0x43b   : > { %v1278_v23 = vld [vmem:[%s2718_s5 + $0x78] sm:$0xff]  ;;  %v1854_v38 = vmov 0.0   ;;  %v1277_v49 = vld [vmem:[%s2718_s5 + $0x70] sm:$0xff]  ;;  %vm1855_vm1 = vmmov 0   ;;  %v1276_v5 = vld [vmem:[%s2718_s5 + $0x68] sm:$0xff] }
 0x43c   : > { %1723 = vmatprep.subr.mxu0 %v1854_v38  ;;  %1755 = vmatprep.mubr.msk.f32.mxu0 %vm1855_vm1, %v1854_v38  ;;  %v1275_v58 = vld [vmem:[%s2718_s5 + $0x60] sm:$0xff]  ;;  %v1274_v0 = vld [vmem:[%s2718_s5 + $0x58] sm:$0xff]  ;;  %v1273_v24 = vld [vmem:[%s2718_s5 + $0x50] sm:$0xff] }
 0x43d   : > { %1724 = vmatpush3.msra.mxu0 %v1278_v23  ;;  %v1272_v6 = vld [vmem:[%s2718_s5 + $0x48] sm:$0xff]  ;;  %v1271_v40 = vld [vmem:[%s2718_s5 + $0x40] sm:$0xff]  ;;  %v1270_v37 = vld [vmem:[%s2718_s5 + $0x38] sm:$0xff] }
 0x43e   : > { %1725 = vmatprep.subr.mxu0 %v1854_v38  ;;  %v1269_v47 = vld [vmem:[%s2718_s5 + $0x30] sm:$0xff]  ;;  %v1268_v48 = vld [vmem:[%s2718_s5 + $0x28] sm:$0xff]  ;;  %v1267_v50 = vld [vmem:[%s2718_s5 + $0x20] sm:$0xff] }
 0x43f   : > { %1726 = vmatpush3.msra.mxu0 %v1277_v49  ;;  %v1266_v51 = vld [vmem:[%s2718_s5 + $0x18] sm:$0xff]  ;;  %v1265_v53 = vld [vmem:[%s2718_s5 + $0x10] sm:$0xff]  ;;  %v1264_v54 = vld [vmem:[%s2718_s5 + $0x8] sm:$0xff] }
 0x440   : > { %1727 = vmatprep.subr.mxu0 %v1854_v38  ;;  %v1263_v56 = vld [vmem:[%s2718_s5] sm:$0xff] }
 0x441   : > { %1728 = vmatpush3.msra.mxu0 %v1276_v5  ;;  %v1436_v57 = vld [vmem:[%s2719_s6] ss:$0 sm:$0xff] }
 0x442   : > { %1729 = vmatprep.subr.mxu0 %v1854_v38 }
 0x443   : > { %1730 = vmatpush3.msra.mxu0 %v1275_v58 }
 0x444   : > { %1731 = vmatprep.subr.mxu0 %v1854_v38 }
 0x445   : > { %1732 = vmatpush3.msra.mxu0 %v1274_v0 }
 0x446   : > { %1733 = vmatprep.subr.mxu0 %v1854_v38 }
 0x447   : > { %1734 = vmatpush3.msra.mxu0 %v1273_v24 }
 0x448   : > { %1735 = vmatprep.subr.mxu0 %v1854_v38 }
 0x449   : > { %1736 = vmatpush3.msra.mxu0 %v1272_v6 }
 0x44a   : > { %1737 = vmatprep.subr.mxu0 %v1854_v38 }
 0x44b   : > { %1738 = vmatpush3.msra.mxu0 %v1271_v40 }
 0x44c   : > { %1739 = vmatprep.subr.mxu0 %v1854_v38 }
 0x44d   : > { %1740 = vmatpush3.msra.mxu0 %v1270_v37 }
 0x44e   : > { %1741 = vmatprep.subr.mxu0 %v1854_v38 }
 0x44f   : > { %1742 = vmatpush3.msra.mxu0 %v1269_v47 }
 0x450   : > { %1743 = vmatprep.subr.mxu0 %v1854_v38 }
 0x451   : > { %1744 = vmatpush3.msra.mxu0 %v1268_v48 }
 0x452   : > { %1745 = vmatprep.subr.mxu0 %v1854_v38 }
 0x453   : > { %1746 = vmatpush3.msra.mxu0 %v1267_v50 }
 0x454   : > { %1747 = vmatprep.subr.mxu0 %v1854_v38 }
 0x455   : > { %1748 = vmatpush3.msra.mxu0 %v1266_v51 }
 0x456   : > { %1749 = vmatprep.subr.mxu0 %v1854_v38 }
 0x457   : > { %1750 = vmatpush3.msra.mxu0 %v1265_v53 }
 0x458   : > { %1751 = vmatprep.subr.mxu0 %v1854_v38 }
 0x459   : > { %1752 = vmatpush3.msra.mxu0 %v1264_v54 }
 0x45a   : > { %1753 = vmatprep.subr.mxu0 %v1854_v38 }
 0x45b   : > { %1754 = vmatpush3.msra.mxu0 %v1263_v56 }
 0x45c   : > { %1756 = vmatmul.mubr.f32.vlgmr.msra.gmra.mxu0 %v1257_v41 }
 0x51c   : > { %v1352_v59 = vpop.f32.mrf.mxu0 }
 0x51d   : > { %v1353_v61 = vadd.f32 %v1436_v57, %v1352_v59 }
 0x51e   : > { %v1757_v62 = vpop.f32.mrf.mxu0 }
 0x51f   : > { %1356 = vst [vmem:[%s2720_s7] sm:$0xff] %v1353_v61 }
 0x520 PF: > { %s17_s26 = sadd.s32 1, %s1849_s26   ;;  %s2775_s24 = smov %s1845_s25 }
 0x521   : > { %p14_p7 = scmp.ge.s32.totalorder %s17_s26, 4   ;;  %s2776_s25 = smov %s2778_s27 }
 0x523   :  { %16 = sbr.rel (!%p14_p7) target bundleno = 2 (0x2), region = 86 }

</bundles_post_ra>
